<compile_context>
chip_gen: v7x
topology: tpu7x:2x2x1
jax: 0.10.0
libtpu: 0.0.40
codegen_flags: <defaults>
</compile_context>

<pallas_src>
import functools

import numpy as np
import jax
import jax.numpy as jnp
from jax.experimental import pallas as pl
from jax.experimental.pallas import tpu as pltpu

_BICUBIC_A = -0.75  # PyTorch / torchvision bicubic (Keys kernel, a = -0.75)


def _cubic(t, a=_BICUBIC_A):
    t = np.abs(t)
    return np.where(
        t <= 1.0,
        (a + 2.0) * t ** 3 - (a + 3.0) * t ** 2 + 1.0,
        np.where(t < 2.0, a * t ** 3 - 5.0 * a * t ** 2 + 8.0 * a * t - 4.0 * a, 0.0),
    )


def _bicubic_weight_matrix(out_size, in_size):
    """W[out, in] s.t. resized = W @ signal  (align_corners=False, border-clamped).

    # TODO(synk): torchvision's tensor path defaults to antialiased bicubic for
    # downscales; antialiasing is not implemented here.
    """
    if out_size == in_size:
        return np.eye(in_size, dtype=np.float32)
    W = np.zeros((out_size, in_size), dtype=np.float32)
    scale = in_size / out_size
    for i in range(out_size):
        x = (i + 0.5) * scale - 0.5
        base = int(np.floor(x))
        t = x - base
        for k in range(-1, 3):
            idx = min(max(base + k, 0), in_size - 1)
            W[i, idx] += float(_cubic(k - t))
    return W


def _round_up(x, m):
    return ((x + m - 1) // m) * m


@functools.lru_cache(maxsize=None)
def _vmem_limit_bytes():
    """Scoped-VMEM limit for the pallas_call: physical capacity minus headroom."""
    cap = 128 << 20
    try:
        info = pltpu.get_tpu_info()
        cap = int(getattr(info, "vmem_capacity_bytes", cap)) or cap
    except Exception:
        pass
    try:  # v7x has 64 MiB per TensorCore; never request more than that there.
        if "v7" in jax.devices()[0].device_kind.lower():
            cap = min(cap, 64 << 20)
    except Exception:
        pass
    return int(min(cap - cap // 4, 100 << 20))  # 25% headroom


def _axis_tile_candidates(dim):
    """(tile, padded_dim) candidates: the full axis (no padding) plus 128-multiples."""
    cands = [(dim, dim)]
    t = 128
    top = min(_round_up(dim, 128), 4096)
    while t <= top:
        cands.append((t, _round_up(dim, t)))
        t += 128
    return cands


@functools.lru_cache(maxsize=None)
def _choose_tiles(H, WC, new_h, new_wc, img_bpe, out_bpe, budget):
    """Pick (TH, H_pad, TWC, WC_pad) so per-step VMEM fits `budget`.

    Tiles are either full-axis (no padding, any size) or multiples of 128 with the
    axis zero-padded up to a multiple of the tile.  Among feasible pairs, prefer
    large per-step image DMAs with a quadratic penalty on padded (wasted) traffic.
    """
    fixed = new_h * new_wc * 4 + 2 * new_h * new_wc * out_bpe  # acc + output block
    avail = max(budget - fixed, 1 << 19)

    def per_step(th, tw):
        return (2 * th * tw * img_bpe          # image tile, double-buffered
                + 2 * new_h * th * 2           # wh tile (bf16), double-buffered
                + 2 * tw * new_wc * 2          # wwt tile (bf16), double-buffered
                + 3 * new_h * tw * 4)          # matmul-1 f32 intermediate + cast

    best, best_score = None, -1.0
    for th, h_pad in _axis_tile_candidates(H):
        for tw, wc_pad in _axis_tile_candidates(WC):
            if per_step(th, tw) > avail:
                continue
            waste = (h_pad * wc_pad) / float(H * WC)      # >= 1.0
            score = (th * tw) / (waste * waste)
            if score > best_score:
                best, best_score = (th, h_pad, tw, wc_pad), score
    if best is None:  # degenerate budget: smallest aligned tiles
        best = (128, _round_up(H, 128), 128, _round_up(WC, 128))
    return best


@functools.lru_cache(maxsize=64)
def _build_weights(H, W, C, new_h, new_w, H_pad, WC_pad):
    """wh: (new_h, H_pad) row-resize weights; wwt: (WC_pad, new_w*C) channel-block-
    diagonal column-resize weights^T.  Zero-padded so padded image rows/cols give 0."""
    wh = np.zeros((new_h, H_pad), np.float32)
    wh[:, :H] = _bicubic_weight_matrix(new_h, H)
    ww_t = _bicubic_weight_matrix(new_w, W).T            # (W, new_w)
    wwt = np.zeros((WC_pad, new_w * C), np.float32)
    for c in range(C):
        wwt[c:W * C:C, c::C] = ww_t
    # bf16 MXU operands; f32 accumulation happens in the kernel.
    # TODO(synk): keep these (and the matmul-1 intermediate) in f32 if preprocessing
    # fidelity tighter than ~1e-2 is required.
    return (jnp.asarray(wh, dtype=jnp.bfloat16),
            jnp.asarray(wwt, dtype=jnp.bfloat16))


def _resize_kernel(img_ref, wh_ref, wwt_ref, out_ref, acc_ref):
    # img_ref: (TH, TWC)        tile of the zero-padded (H_pad, WC_pad) fused HWC image
    # wh_ref:  (new_h, TH)      row-resize weight tile, bf16
    # wwt_ref: (TWC, new_w*C)   channel-block-diagonal col-resize weights^T tile, bf16
    # out_ref: (new_h, new_w*C) lane-dense resized slab (written once, last step)
    # acc_ref: (new_h, new_w*C) f32 accumulator, resident across the whole grid
    kw = pl.program_id(0)
    kh = pl.program_id(1)

    @pl.when(jnp.logical_and(kw == 0, kh == 0))
    def _init():
        acc_ref[...] = jnp.zeros_like(acc_ref)

    img_blk = img_ref[...].astype(jnp.bfloat16)                   # bf16 MXU operands
    tmp = jnp.dot(wh_ref[...], img_blk,
                  preferred_element_type=jnp.float32)             # (new_h, TWC) f32
    acc_ref[...] += jnp.dot(tmp.astype(jnp.bfloat16), wwt_ref[...],
                            preferred_element_type=jnp.float32)   # (new_h, new_w*C)

    @pl.when(jnp.logical_and(kw == pl.num_programs(0) - 1,
                             kh == pl.num_programs(1) - 1))
    def _finalize():
        out_ref[...] = acc_ref[...].astype(out_ref.dtype)


@functools.partial(
    jax.jit,
    static_argnames=("new_h", "new_w", "C", "max_size", "fill",
                     "TH", "TWC", "H_pad", "WC_pad", "vmem_limit"))
def _resize_and_pad(img, wh, wwt, *, new_h, new_w, C, max_size, fill,
                    TH, TWC, H_pad, WC_pad, vmem_limit):
    H, W = img.shape[0], img.shape[1]
    WC, new_wc = W * C, new_w * C

    img2d = jnp.reshape(img, (H, WC))          # free/contiguous; no HBM transpose
    if H_pad != H or WC_pad != WC:
        # Zero-pad (never rely on OOB reads: 0-weight * garbage could be NaN).
        img2d = jnp.pad(img2d, ((0, H_pad - H), (0, WC_pad - WC)))

    grid = (WC_pad // TWC, H_pad // TH)        # W*C outer, H inner: the large wwt tile
                                               # is fetched once per outer step.
    out2d = pl.pallas_call(
        _resize_kernel,
        out_shape=jax.ShapeDtypeStruct((new_h, new_wc), img.dtype),
        grid=grid,
        in_specs=[
            pl.BlockSpec((TH, TWC), lambda kw, kh: (kh, kw)),
            pl.BlockSpec((new_h, TH), lambda kw, kh: (0, kh)),
            pl.BlockSpec((TWC, new_wc), lambda kw, kh: (kw, 0)),
        ],
        out_specs=pl.BlockSpec((new_h, new_wc), lambda kw, kh: (0, 0)),
        scratch_shapes=[pltpu.VMEM((new_h, new_wc), jnp.float32)],
        compiler_params=pltpu.CompilerParams(
            dimension_semantics=("arbitrary", "arbitrary"),  # both are reduction axes
            vmem_limit_bytes=vmem_limit,
        ),
    )(img2d, wh, wwt)

    resized = jnp.reshape(out2d, (new_h, new_w, C))   # free reshape back to HWC
    pad_h, pad_w = max_size - new_h, max_size - new_w
    return jnp.pad(
        resized,
        ((pad_h // 2, pad_h - pad_h // 2),
         (pad_w // 2, pad_w - pad_w // 2),
         (0, 0)),
        constant_values=jnp.asarray(fill, img.dtype))


def resize_max_size(img, max_size, fill=0.0, *, _tile_budget_override=None):
    """Pallas equivalent of ResizeMaxSize.forward for an HWC float image."""
    # TODO(synk): integer (uint8) images would need round+clamp on the final cast;
    # this path assumes a floating-point image.
    if img.ndim != 3:
        raise ValueError(f"expected an HWC image, got shape {img.shape}")
    H, W, C = map(int, img.shape)
    scale = max_size / float(max(H, W))

    if scale == 1.0 and H == W:
        return img                                    # module returns input unchanged

    if scale != 1.0:
        new_h, new_w = int(round(H * scale)), int(round(W * scale))
    else:
        new_h, new_w = H, W

    pad_h, pad_w = max_size - new_h, max_size - new_w

    if scale == 1.0:                                  # pad-only branch (H != W)
        return jnp.pad(
            img,
            ((pad_h // 2, pad_h - pad_h // 2),
             (pad_w // 2, pad_w - pad_w // 2), (0, 0)),
            constant_values=jnp.asarray(fill, img.dtype))

    img_bpe = int(np.dtype(img.dtype).itemsize)
    budget = (int(_tile_budget_override) if _tile_budget_override is not None
              else int(0.85 * _vmem_limit_bytes()))
    TH, H_pad, TWC, WC_pad = _choose_tiles(H, W * C, new_h, new_w * C,
                                           img_bpe, img_bpe, budget)
    wh, wwt = _build_weights(H, W, C, new_h, new_w, H_pad, WC_pad)
    return _resize_and_pad(
        img, wh, wwt,
        new_h=new_h, new_w=new_w, C=C, max_size=int(max_size), fill=float(fill),
        TH=TH, TWC=TWC, H_pad=H_pad, WC_pad=WC_pad,
        vmem_limit=int(_vmem_limit_bytes()))


def _reference(img_np, max_size, fill=0.0):
    """Pure-numpy f32 reference (same separable-bicubic weights)."""
    H, W, C = img_np.shape
    scale = max_size / float(max(H, W))
    if scale == 1.0 and H == W:
        return img_np
    if scale != 1.0:
        new_h, new_w = int(round(H * scale)), int(round(W * scale))
    else:
        new_h, new_w = H, W
    wh = _bicubic_weight_matrix(new_h, H)
    ww = _bicubic_weight_matrix(new_w, W)
    resized = np.einsum('ih,hwc->iwc', wh, img_np.astype(np.float32))
    resized = np.einsum('jw,iwc->ijc', ww, resized)
    out = np.full((max_size, max_size, C), fill, np.float32)
    pt, plft = (max_size - new_h) // 2, (max_size - new_w) // 2
    out[pt:pt + new_h, plft:plft + new_w, :] = resized
    return out


if __name__ == "__main__":
    key = jax.random.PRNGKey(0)
    k1, k2, k3 = jax.random.split(key, 3)

    # Case 1: small upscale (single-block fast path): H=16, W=12, C=3 -> 24x24.
    H, W, C, MAX_SIZE = 16, 12, 3, 24
    img = jax.random.uniform(k1, (H, W, C), dtype=jnp.float32)
    out = jax.block_until_ready(resize_max_size(img, MAX_SIZE, fill=0.0))
    assert out.shape == (MAX_SIZE, MAX_SIZE, C), out.shape
    assert out.dtype == img.dtype
    ref = _reference(np.asarray(img), MAX_SIZE, fill=0.0)
    err = float(np.max(np.abs(ref - np.asarray(out, dtype=np.float32))))
    assert err < 0.08, f"case1 max abs err {err}"  # bf16 operands, f32 accumulation

    # Case 2: downscale with a forced-tiny tile budget so both the H and W*C axes are
    # tiled and zero-padded (exercises the multi-step two-axis accumulator path).
    H, W, C, MAX_SIZE = 300, 180, 3, 224
    img = jax.random.uniform(k2, (H, W, C), dtype=jnp.float32)
    out = jax.block_until_ready(
        resize_max_size(img, MAX_SIZE, fill=0.5, _tile_budget_override=2_000_000))
    assert out.shape == (MAX_SIZE, MAX_SIZE, C), out.shape
    assert out.dtype == img.dtype
    ref = _reference(np.asarray(img), MAX_SIZE, fill=0.5)
    err = float(np.max(np.abs(ref - np.asarray(out, dtype=np.float32))))
    assert err < 0.08, f"case2 max abs err {err}"

    # Case 3: scale == 1.0 and H != W -> pad-only branch (no kernel launch).
    H, W, C, MAX_SIZE = 24, 16, 3, 24
    img = jax.random.uniform(k3, (H, W, C), dtype=jnp.float32)
    out = jax.block_until_ready(resize_max_size(img, MAX_SIZE, fill=0.0))
    assert out.shape == (MAX_SIZE, MAX_SIZE, C), out.shape
    ref = _reference(np.asarray(img), MAX_SIZE, fill=0.0)
    np.testing.assert_allclose(np.asarray(out), ref, atol=1e-6)

    print("KERNEL_OK")
</pallas_src>

<mosaic_0001>
module attributes {stable_mosaic.version = 11 : i64} {
  func.func @_resize_kernel(%arg0: i32, %arg1: i32, %arg2: memref<16x36xf32, #tpu.memory_space<vmem>>, %arg3: memref<24x16xbf16, #tpu.memory_space<vmem>>, %arg4: memref<36x54xbf16, #tpu.memory_space<vmem>>, %arg5: memref<24x54xf32, #tpu.memory_space<vmem>>, %arg6: memref<24x54xf32, #tpu.memory_space<vmem>>) attributes {dimension_semantics = [#tpu.dimension_semantics<arbitrary>, #tpu.dimension_semantics<arbitrary>], iteration_bounds = array<i64: 1, 1>, scalar_prefetch = 0 : i64, scratch_operands = 1 : i64, tpu.core_type = #tpu.core_type<tc>, window_params = [{transform_indices = @transform_0, window_bounds = array<i64: 16, 36>}, {transform_indices = @transform_1, window_bounds = array<i64: 24, 16>}, {transform_indices = @transform_2, window_bounds = array<i64: 36, 54>}, {pipeline_mode = #tpu.pipeline_mode<synchronous>, transform_indices = @transform_3, window_bounds = array<i64: 24, 54>}]} {
    %c0_i32 = arith.constant 0 : i32
    %0 = arith.cmpi eq, %arg0, %c0_i32 : i32
    %c0_i32_0 = arith.constant 0 : i32
    %1 = arith.cmpi eq, %arg1, %c0_i32_0 : i32
    %2 = arith.andi %0, %1 : i1
    %3 = arith.extui %2 : i1 to i32
    %c0_i32_1 = arith.constant 0 : i32
    %4 = arith.cmpi ne, %3, %c0_i32_1 : i32
    scf.if %4 {
      %cst_15 = arith.constant 0.000000e+00 : f32
      %20 = vector.broadcast %cst_15 : f32 to vector<24x54xf32>
      %c0_16 = arith.constant 0 : index
      %c0_17 = arith.constant 0 : index
      %21 = vector.load %arg6[%c0_16, %c0_17] : memref<24x54xf32, #tpu.memory_space<vmem>>, vector<24x54xf32>
      tpu.vector_store %arg6[%c0_16, %c0_17], %20 {strides = array<i32>} : memref<24x54xf32, #tpu.memory_space<vmem>>, vector<24x54xf32>,
    } else {
    }
    %c0 = arith.constant 0 : index
    %c0_2 = arith.constant 0 : index
    %5 = vector.load %arg2[%c0, %c0_2] : memref<16x36xf32, #tpu.memory_space<vmem>>, vector<16x36xf32>
    %6 = arith.truncf %5 : vector<16x36xf32> to vector<16x36xbf16>
    %c0_3 = arith.constant 0 : index
    %c0_4 = arith.constant 0 : index
    %7 = vector.load %arg3[%c0_3, %c0_4] : memref<24x16xbf16, #tpu.memory_space<vmem>>, vector<24x16xbf16>
    %cst = arith.constant dense<0.000000e+00> : vector<24x36xf32>
    %8 = tpu.matmul %7, %6, %cst {dimension_numbers = #tpu.dot_dimension_numbers<[1], [0], [0], [1], [0, 0, 1, 1], [], []>} : vector<24x16xbf16>, vector<16x36xbf16>, vector<24x36xf32> -> vector<24x36xf32>
    %c0_5 = arith.constant 0 : index
    %c0_6 = arith.constant 0 : index
    %9 = vector.load %arg6[%c0_5, %c0_6] : memref<24x54xf32, #tpu.memory_space<vmem>>, vector<24x54xf32>
    %10 = arith.truncf %8 : vector<24x36xf32> to vector<24x36xbf16>
    %c0_7 = arith.constant 0 : index
    %c0_8 = arith.constant 0 : index
    %11 = vector.load %arg4[%c0_7, %c0_8] : memref<36x54xbf16, #tpu.memory_space<vmem>>, vector<36x54xbf16>
    %cst_9 = arith.constant dense<0.000000e+00> : vector<24x54xf32>
    %12 = tpu.matmul %10, %11, %cst_9 {dimension_numbers = #tpu.dot_dimension_numbers<[1], [0], [0], [1], [0, 0, 1, 1], [], []>} : vector<24x36xbf16>, vector<36x54xbf16>, vector<24x54xf32> -> vector<24x54xf32>
    %13 = arith.addf %9, %12 : vector<24x54xf32>
    %c0_10 = arith.constant 0 : index
    %c0_11 = arith.constant 0 : index
    %14 = vector.load %arg6[%c0_10, %c0_11] : memref<24x54xf32, #tpu.memory_space<vmem>>, vector<24x54xf32>
    tpu.vector_store %arg6[%c0_10, %c0_11], %13 {strides = array<i32>} : memref<24x54xf32, #tpu.memory_space<vmem>>, vector<24x54xf32>,
    %c0_i32_12 = arith.constant 0 : i32
    %15 = arith.cmpi eq, %arg0, %c0_i32_12 : i32
    %c0_i32_13 = arith.constant 0 : i32
    %16 = arith.cmpi eq, %arg1, %c0_i32_13 : i32
    %17 = arith.andi %15, %16 : i1
    %18 = arith.extui %17 : i1 to i32
    %c0_i32_14 = arith.constant 0 : i32
    %19 = arith.cmpi ne, %18, %c0_i32_14 : i32
    scf.if %19 {
      %c0_15 = arith.constant 0 : index
      %c0_16 = arith.constant 0 : index
      %20 = vector.load %arg6[%c0_15, %c0_16] : memref<24x54xf32, #tpu.memory_space<vmem>>, vector<24x54xf32>
      %c0_17 = arith.constant 0 : index
      %c0_18 = arith.constant 0 : index
      %21 = vector.load %arg5[%c0_17, %c0_18] : memref<24x54xf32, #tpu.memory_space<vmem>>, vector<24x54xf32>
      tpu.vector_store %arg5[%c0_17, %c0_18], %20 {strides = array<i32>} : memref<24x54xf32, #tpu.memory_space<vmem>>, vector<24x54xf32>,
    } else {
    }
    return
  }
  func.func @transform_0(%arg0: i32, %arg1: i32) -> (i32, i32) {
    %c0_i32 = arith.constant 0 : i32
    return %arg1, %arg0 : i32, i32
  }
  func.func @transform_1(%arg0: i32, %arg1: i32) -> (i32, i32) {
    %c0_i32 = arith.constant 0 : i32
    %c0_i32_0 = arith.constant 0 : i32
    return %c0_i32, %arg1 : i32, i32
  }
  func.func @transform_2(%arg0: i32, %arg1: i32) -> (i32, i32) {
    %c0_i32 = arith.constant 0 : i32
    %c0_i32_0 = arith.constant 0 : i32
    return %arg0, %c0_i32 : i32, i32
  }
  func.func @transform_3(%arg0: i32, %arg1: i32) -> (i32, i32) {
    %c0_i32 = arith.constant 0 : i32
    %c0_i32_0 = arith.constant 0 : i32
    %c0_i32_1 = arith.constant 0 : i32
    return %c0_i32, %c0_i32_0 : i32, i32
  }
}

</mosaic_0001>

<bundles_post_ra>
// kernel: _resize_and_pad.1
= control target key start
LH: loop header
LB: loop body
LE: loop exit
PB: predicated region body
PF: predicated region fallthrough
CT: control target
= control target key end

     0   :  { %8 = vsyncpa [#allocation4], 0  ;;  %s493_s0 = inlined_call_operand.hbm [shape: f32[16,36], index: 0, kind: input, shape index: {}]   ;;  %s494_s1 = inlined_call_operand.hbm [shape: bf16[24,16], index: 1, kind: input, shape index: {}]   ;;  %s495_s2 = inlined_call_operand.hbm [shape: bf16[36,54], index: 2, kind: input, shape index: {}]   ;;  %s496_s3 = inlined_call_operand.hbm [shape: f32[24,54], index: 3, kind: output, shape index: {}]  }
   0x1   :  { %9 = vsyncpa [#allocation7], 0 }
   0x2   :  { %10 = vsyncpa [#allocation5], 0  ;;  %s395_s12 = smov [#allocation6]   ;;  %s301_s16 = scalar_lea.hbm %s494_s1, 192 }
   0x3   :  { %s28_s13 = sshll.u32 %s395_s12, 4  ;;  %p302_p0 = scmp.ne.s32.totalorder %s494_s1, %s301_s16  ;;  %s29_s13 = int_to_ptr.vmem [resolvable:$true] %s28_s13 }
   0x4   :  { %p305_p1 = scmp.lt.u32.totalorder %s301_s16, %s494_s1 }
   0x6   :  { %p307_p2 = pnand %p305_p1, %p302_p0 }
   0x8   :  { %310 = shalt.err (!%p307_p2)
}
   0x9   :  { %s311_s21 = scalar_lea.vmem %s29_s13, 192  ;;  %p316_p4 = scmp.lt.s32.totalorder %s29_s13, %s29_s13 }
   0xa   :  { %p312_p3 = scmp.ne.s32.totalorder %s29_s13, %s311_s21  ;;  %p317_p5 = scmp.lt.s32.totalorder %s311_s21, %s311_s21 }
   0xc   :  { %p318_p6 = por %p317_p5, %p316_p4 }
   0xe   :  { %p319_p7 = pnand %p318_p6, %p312_p3 }
  0x10   :  { %322 = shalt.err (!%p319_p7)
}
  0x11   :  { %s396_s22 = smov 64   ;;  %s397_s23 = smov 4  }
  0x12   :  { %34 = dma.hbm_to_vmem [thread:$0]  %s494_s1, 192, %s29_s13, [#allocation7], %s396_s22, %s396_s22, %s397_s23  }
  0x13   :  { %s398_s26 = smov [#allocation3]   ;;  %s323_s30 = scalar_lea.hbm %s493_s0, 256 }
  0x14   :  { %s16_s27 = sshll.u32 %s398_s26, 4  ;;  %p324_p8 = scmp.ne.s32.totalorder %s493_s0, %s323_s30  ;;  %s17_s27 = int_to_ptr.vmem [resolvable:$true] %s16_s27 }
  0x15   :  { %p327_p9 = scmp.lt.u32.totalorder %s323_s30, %s493_s0 }
  0x17   :  { %p329_p10 = pnand %p327_p9, %p324_p8 }
  0x19   :  { %332 = shalt.err (!%p329_p10)
}
  0x1a   :  { %s333_s8 = scalar_lea.vmem %s17_s27, 256  ;;  %p338_p12 = scmp.lt.s32.totalorder %s17_s27, %s17_s27 }
  0x1b   :  { %p334_p11 = scmp.ne.s32.totalorder %s17_s27, %s333_s8  ;;  %p339_p13 = scmp.lt.s32.totalorder %s333_s8, %s333_s8 }
  0x1d   :  { %p340_p0 = por %p339_p13, %p338_p12 }
  0x1f   :  { %p341_p1 = pnand %p340_p0, %p334_p11 }
  0x21   :  { %344 = shalt.err (!%p341_p1)
}
  0x22   :  { %s399_s1 = smov 128   ;;  %s400_s9 = smov 8  }
  0x23   :  { %22 = dma.hbm_to_vmem [thread:$0]  %s493_s0, 256, %s17_s27, [#allocation4], %s399_s1, %s399_s1, %s400_s9  }
  0x24   :  { %s401_s12 = smov [#allocation8]   ;;  %s345_s16 = scalar_lea.hbm %s495_s2, 320 }
  0x25   :  { %s40_s13 = sshll.u32 %s401_s12, 4  ;;  %p346_p2 = scmp.ne.s32.totalorder %s495_s2, %s345_s16  ;;  %s41_s13 = int_to_ptr.vmem [resolvable:$true] %s40_s13 }
  0x26   :  { %p349_p3 = scmp.lt.u32.totalorder %s345_s16, %s495_s2 }
  0x28   :  { %p351_p4 = pnand %p349_p3, %p346_p2 }
  0x2a   :  { %354 = shalt.err (!%p351_p4)
}
  0x2b   :  { %s355_s21 = scalar_lea.vmem %s41_s13, 320  ;;  %p360_p6 = scmp.lt.s32.totalorder %s41_s13, %s41_s13 }
  0x2c   :  { %p356_p5 = scmp.ne.s32.totalorder %s41_s13, %s355_s21  ;;  %p361_p7 = scmp.lt.s32.totalorder %s355_s21, %s355_s21 }
  0x2e   :  { %p362_p8 = por %p361_p7, %p360_p6 }
  0x30   :  { %p363_p9 = pnand %p362_p8, %p356_p5 }
  0x32   :  { %366 = shalt.err (!%p363_p9)
}
  0x33   :  { %46 = dma.hbm_to_vmem [thread:$0]  %s495_s2, 320, %s41_s13, [#allocation7], %s396_s22, %s396_s22, %s397_s23  }
  0x34   :  { %389 = dma.done.wait [#allocation4], 256  }
  0x35   :  { %390 = vsyncadd [#allocation4], 4294967040 }
  0x36   :  { %391 = dma.done.wait [#allocation7], 512  }
  0x37   :  { %392 = vsyncadd [#allocation7], 4294966784  ;;  %v67_v0 = vld [vmem:[#allocation3] sm:$0xff]  ;;  %v68_v1 = vld [vmem:[#allocation3 + $0x8] sm:$0xff]  ;;  %vm81_vm0 = vcmask 130048   ;;  %vm168_vm1 = vcmask 1041408  }
  0x38   :  { %v69_v2 = vpack.c.bf16 %v68_v1, %v67_v0  ;;  %v296_v3 = vld [vmem:[#allocation6] sm:$0xff]   ;;  %v297_v4 = vld [vmem:[#allocation6 + $0x8] ss:$0 sps:$4 sm:$0xff]   ;;  %v298_v5 = vld [vmem:[#allocation8] sm:$0xff]   ;;  %vm63_vm2 = vcmask 441344   ;;  %v402_v9 = vmov 0.0  }
  0x39   :  { %272 = vmatprep.mubr.msk.bf16.mxu0 %vm81_vm0, %v296_v3  ;;  %v299_v6 = vld [vmem:[#allocation8 + $0x8] sm:$0xff]   ;;  %276 = vmatprep.subr.bf16.mxu1 %v298_v5  ;;  %v300_v7 = vld [vmem:[#allocation8 + $0x10] ss:$0 sps:$4 sm:$0x33]   ;;  %66 = vst.msk [vmem:[#allocation2 + $0x10] sm:$0xff] %vm63_vm2, %v402_v9  ;;  %64 = vst.msk [vmem:[#allocation2] sm:$0xff] %vm63_vm2, %v402_v9 }
  0x3a   :  { %270 = vmatprep.subr.bf16.mxu0 %v69_v2  ;;  %277 = vmatpush3.bf16.msra.mxu1 %v298_v5  ;;  %v170_v8 = vsel %vm168_vm1, %v300_v7, 0  ;;  %65 = vst.msk [vmem:[#allocation2 + $0x8] sm:$0xff] %vm63_vm2, %v402_v9  ;;  %vm161_vm3 = vcmask 293888   ;;  %s403_s2 = smov [#allocation9]  }
  0x3b   :  { %271 = vmatpush3.bf16.msra.mxu0 %v69_v2  ;;  %278 = vmatprep.subr.bf16.mxu1 %v299_v6  ;;  %s240_s22 = sshll.u32 %s403_s2, 4  ;;  %s241_s22 = int_to_ptr.vmem [resolvable:$true] %s240_s22 }
  0x3c   :  { %s367_s23 = scalar_lea.vmem %s241_s22, 384  ;;  %p372_p11 = scmp.lt.s32.totalorder %s241_s22, %s241_s22 }
  0x3d   :  { %p368_p10 = scmp.ne.s32.totalorder %s241_s22, %s367_s23  ;;  %p373_p12 = scmp.lt.s32.totalorder %s367_s23, %s367_s23 }
  0x3e   :  { %273 = vmatmul.mubr.msk.bf16.vlgmr.msra.gmra.mrb[0].mxu0 %vm81_vm0, %v297_v4  ;;  %279 = vmatpush3.bf16.msra.mxu1 %v299_v6 }
  0x3f   :  { %286 = vmatprep.subr.msk.bf16.mxu1 %vm168_vm1, %v300_v7  ;;  %p374_p13 = por %p373_p12, %p372_p11 }
  0x40   :  { %v138_v16 = vld [vmem:[#allocation2 + $0x10] sm:$0xff]  ;;  %v136_v17 = vld [vmem:[#allocation2] sm:$0xff] }
  0x41   :  { %v137_v21 = vld [vmem:[#allocation2 + $0x8] sm:$0xff]  ;;  %p375_p0 = pnand %p374_p13, %p368_p10 }
  0x42   :  { %281 = vmatpush3.bf16.msra.mxu1 %v170_v8 }
 0x111   :  { %v274_v10 = vpop.f32.mrb[0].mxu0 }
 0x112   :  { %v122_v11 = vpop.f32.mrb[1].mxu0  ;;  %v140_v15 = vpack.c.bf16 %v274_v10, %v274_v10 }
 0x113   :  { %v275_v12 = vpop.f32.mrb[2].mxu0 }
 0x114   :  { %v125_v13 = vpop.f32.mrb[3].mxu0 }
 0x115   :  { %v139_v14 = vpack.c.bf16 %v125_v13, %v122_v11 }
 0x117   :  { %282 = vmatprep.mubr.msk.bf16.mxu1 %vm161_vm3, %v139_v14 }
 0x118   :  { %283 = vmatmul.mubr.msk.bf16.vlgmr.msra.gmra.mrb[0].mxu1 %vm161_vm3, %v140_v15 }
 0x1eb   :  { %v284_v18 = vpop.f32.mrb[0].mxu1 }
 0x1ec   :  { %v222_v19 = vadd.f32 %v284_v18, %v138_v16  ;;  %v206_v20 = vpop.f32.mrb[1].mxu1 }
 0x1ed   :  { %v220_v22 = vadd.f32 %v206_v20, %v136_v17  ;;  %v285_v23 = vpop.f32.mrb[2].mxu1 }
 0x1ee   :  { %226 = vst.msk [vmem:[#allocation2 + $0x10] sm:$0xff] %vm63_vm2, %v222_v19  ;;  %v209_v24 = vpop.f32.mrb[3].mxu1 }
 0x1ef   :  { %224 = vst.msk [vmem:[#allocation2] sm:$0xff] %vm63_vm2, %v220_v22  ;;  %v221_v25 = vadd.f32 %v209_v24, %v137_v21 }
 0x1f1   :  { %225 = vst.msk [vmem:[#allocation2 + $0x8] sm:$0xff] %vm63_vm2, %v221_v25 }
 0x1f5   :  { %v231_v26 = vld [vmem:[#allocation2 + $0x10] sm:$0xff] }
 0x1f6   :  { %v229_v27 = vld [vmem:[#allocation2] sm:$0xff]  ;;  %234 = vst.msk [vmem:[#allocation9 + $0x10] sm:$0xff] %vm63_vm2, %v231_v26 }
 0x1f7   :  { %232 = vst.msk [vmem:[#allocation9] sm:$0xff] %vm63_vm2, %v229_v27 }
 0x1f8   :  { %v230_v28 = vld [vmem:[#allocation2 + $0x8] sm:$0xff] }
 0x1f9   :  { %233 = vst.msk [vmem:[#allocation9 + $0x8] sm:$0xff] %vm63_vm2, %v230_v28 }
 0x1fa   :  { %378 = shalt.err (!%p375_p0)
}
 0x1fb   :  { %s379_s27 = scalar_lea.hbm %s496_s3, 384 }
 0x1fc   :  { %p380_p1 = scmp.ne.s32.totalorder %s496_s3, %s379_s27  ;;  %p383_p2 = scmp.lt.u32.totalorder %s379_s27, %s496_s3 }
 0x1fe   :  { %p385_p3 = pnand %p383_p2, %p380_p1 }
 0x200   :  { %388 = shalt.err (!%p385_p3)
}
 0x201   :  { %246 = dma.vmem_to_hbm [thread:$0]  %s241_s22, 384, %s496_s3, [#allocation5], %s399_s1, %s399_s1, %s400_s9  }
 0x202   :  { %393 = dma.done.wait [#allocation5], 384  }
 0x203   :  { %394 = vsyncadd [#allocation5], 4294966912 }
 0x204   :  { %250 = vsyncpa [#allocation4], 1 }
 0x205   :  { %251 = vsyncpa [#allocation7], 1 }
 0x206   :  { %252 = vsyncpa [#allocation5], 1 }

</bundles_post_ra>
